<compile_context>
chip_gen: v7x
topology: tpu7x:2x2x1
jax: 0.10.0
libtpu: 0.0.40
codegen_flags: <defaults>
</compile_context>

<pallas_src>
import jax
import jax.numpy as jnp
from jax import lax
from jax.experimental import pallas as pl
from jax.experimental.pallas import tpu as pltpu


def _round_up(x, m):
    return ((x + m - 1) // m) * m


# -----------------------------------------------------------------------------
# Kernels
# -----------------------------------------------------------------------------
def _linear_bias_kernel(x_ref, w_ref, b_ref, o_ref):
    """Single-K-block path: one MXU dot + fused bias epilogue.

    x_ref: (tm, K)  bf16
    w_ref: (tn, K)  bf16   (native nn.Linear [N, K] layout)
    b_ref: (1,  tn) f32
    o_ref: (tm, tn) f32
    """
    acc = lax.dot_general(
        x_ref[...], w_ref[...],
        dimension_numbers=(((1,), (1,)), ((), ())),  # contract K of both operands
        preferred_element_type=jnp.float32,
    )
    o_ref[...] = acc + b_ref[...]


def _linear_bias_kernel_ktiled(x_ref, w_ref, b_ref, o_ref):
    """K-tiled path: accumulate straight into the VMEM-resident f32 output tile."""
    k = pl.program_id(2)

    @pl.when(k == 0)
    def _():
        # Initialize the resident output tile with the (broadcast) bias once.
        o_ref[...] = jnp.broadcast_to(b_ref[...], o_ref.shape)

    o_ref[...] += lax.dot_general(
        x_ref[...], w_ref[...],
        dimension_numbers=(((1,), (1,)), ((), ())),
        preferred_element_type=jnp.float32,
    )


# -----------------------------------------------------------------------------
# Wrapper
# -----------------------------------------------------------------------------
def encoder_forward(
    X,
    W,
    b,
    *,
    compute_dtype=jnp.bfloat16,
    m_cap=512,
    n_cap=512,
    tk_tiled=1024,
    vmem_limit_bytes=48 * 1024 * 1024,
):
    """Forward pass of Encoder: X @ W^T + b.

    Args:
      X: [batch, n_features] float32.
      W: [n_clusters, n_features] float32 (PyTorch nn.Linear weight layout).
      b: [n_clusters] float32.
    Returns:
      [batch, n_clusters] float32.
    """
    X = jnp.asarray(X)
    W = jnp.asarray(W)
    b = jnp.asarray(b)

    M, K = X.shape
    N, Kw = W.shape
    assert Kw == K, "W must be [n_clusters, n_features]"

    # --- Adaptive tile selection --------------------------------------------
    # A block equal to the full array dim is always legal, so small dims are
    # used as-is (no padding to 128). Large dims use 512-wide (8/128-aligned)
    # tiles, which also satisfies the 256-wide MXU on v6e/v7x.
    if M <= m_cap:
        tm, Mp = M, M
    else:
        tm = m_cap
        Mp = _round_up(M, tm)

    if N <= n_cap:
        tn, Np = N, N
    else:
        tn = n_cap
        Np = _round_up(N, tn)

    in_bytes = jnp.dtype(compute_dtype).itemsize

    def _footprint(tk):
        # Double-buffered X / W input tiles + double-buffered f32 output tile
        # + bias row.
        return (2 * (tm * tk + tn * tk) * in_bytes
                + 2 * (tm * tn * 4)
                + 2 * tn * 4)

    budget = int(0.8 * vmem_limit_bytes)  # headroom inside the scoped limit

    if _footprint(K) <= budget:
        # Collapse the whole reduction into one block: no K grid axis, no
        # accumulator scratch, each input tile read exactly once per out tile.
        tk, Kp, k_tiled = K, K, False
    else:
        tk = tk_tiled
        while _footprint(tk) > budget and tk > 128:
            tk //= 2
        Kp = _round_up(K, tk)
        k_tiled = True

    # --- Cast + pad (pad only when a tiled dim is ragged) --------------------
    Xc = X.astype(compute_dtype)
    Wc = W.astype(compute_dtype)                 # native [N, K]; no transpose
    bc = b.astype(jnp.float32).reshape(1, N)

    if (Mp, Kp) != (M, K):
        Xc = jnp.pad(Xc, ((0, Mp - M), (0, Kp - K)))
    if (Np, Kp) != (N, K):
        Wc = jnp.pad(Wc, ((0, Np - N), (0, Kp - K)))
    if Np != N:
        bc = jnp.pad(bc, ((0, 0), (0, Np - N)))

    cost = pl.CostEstimate(
        flops=2 * Mp * Np * Kp,
        transcendentals=0,
        bytes_accessed=(Mp * Kp + Np * Kp) * in_bytes + Mp * Np * 4 + Np * 4,
    )

    if not k_tiled:
        grid = (Mp // tm, Np // tn)
        out = pl.pallas_call(
            _linear_bias_kernel,
            out_shape=jax.ShapeDtypeStruct((Mp, Np), jnp.float32),
            grid=grid,
            in_specs=[
                pl.BlockSpec((tm, Kp), lambda i, j: (i, 0)),   # X tile
                pl.BlockSpec((tn, Kp), lambda i, j: (j, 0)),   # W tile ([N, K])
                pl.BlockSpec((1, tn), lambda i, j: (0, j)),    # bias row
            ],
            out_specs=pl.BlockSpec((tm, tn), lambda i, j: (i, j)),
            compiler_params=pltpu.CompilerParams(
                dimension_semantics=("parallel", "parallel"),
                vmem_limit_bytes=vmem_limit_bytes,
            ),
            cost_estimate=cost,
        )(Xc, Wc, bc)
    else:
        grid = (Mp // tm, Np // tn, Kp // tk)
        out = pl.pallas_call(
            _linear_bias_kernel_ktiled,
            out_shape=jax.ShapeDtypeStruct((Mp, Np), jnp.float32),
            grid=grid,
            in_specs=[
                pl.BlockSpec((tm, tk), lambda i, j, k: (i, k)),  # X tile
                pl.BlockSpec((tn, tk), lambda i, j, k: (j, k)),  # W tile ([N, K])
                pl.BlockSpec((1, tn), lambda i, j, k: (0, j)),   # bias row
            ],
            out_specs=pl.BlockSpec((tm, tn), lambda i, j, k: (i, j)),
            compiler_params=pltpu.CompilerParams(
                dimension_semantics=("parallel", "parallel", "arbitrary"),
                vmem_limit_bytes=vmem_limit_bytes,
            ),
            cost_estimate=cost,
        )(Xc, Wc, bc)

    if (Mp, Np) != (M, N):
        out = out[:M, :N]
    return out


if __name__ == "__main__":
    key = jax.random.PRNGKey(0)
    k_x, k_w, k_b = jax.random.split(key, 3)

    batch, n_features, n_clusters = 8, 32, 16

    # PyTorch nn.Linear default init: U(-1/sqrt(in_features), 1/sqrt(in_features)).
    bound = 1.0 / (n_features ** 0.5)
    X = jax.random.normal(k_x, (batch, n_features), jnp.float32)
    W = jax.random.uniform(k_w, (n_clusters, n_features), jnp.float32, -bound, bound)
    b = jax.random.uniform(k_b, (n_clusters,), jnp.float32, -bound, bound)

    s = encoder_forward(X, W, b)
    jax.block_until_ready(s)

    # Plain-JAX f32 reference of the forward pass.
    ref = X @ W.T + b
    assert s.shape == (batch, n_clusters) and s.dtype == jnp.float32
    # bf16 operands with f32 accumulation -> loosened tolerance vs f32 reference.
    assert jnp.allclose(s, ref, atol=2e-2, rtol=2e-2), "mismatch vs reference"

    print("KERNEL_OK")
</pallas_src>

<mosaic_0001>
module attributes {stable_mosaic.version = 11 : i64} {
  func.func @_linear_bias_kernel(%arg0: i32, %arg1: i32, %arg2: memref<8x32xbf16, #tpu.memory_space<vmem>>, %arg3: memref<16x32xbf16, #tpu.memory_space<vmem>>, %arg4: memref<1x16xf32, #tpu.memory_space<vmem>>, %arg5: memref<8x16xf32, #tpu.memory_space<vmem>>) attributes {dimension_semantics = [#tpu.dimension_semantics<parallel>, #tpu.dimension_semantics<parallel>], iteration_bounds = array<i64: 1, 1>, scalar_prefetch = 0 : i64, scratch_operands = 0 : i64, tpu.core_type = #tpu.core_type<tc>, window_params = [{transform_indices = @transform_0, window_bounds = array<i64: 8, 32>}, {transform_indices = @transform_1, window_bounds = array<i64: 16, 32>}, {transform_indices = @transform_2, window_bounds = array<i64: 1, 16>}, {transform_indices = @transform_3, window_bounds = array<i64: 8, 16>}]} {
    %c0 = arith.constant 0 : index
    %c0_0 = arith.constant 0 : index
    %0 = vector.load %arg2[%c0, %c0_0] : memref<8x32xbf16, #tpu.memory_space<vmem>>, vector<8x32xbf16>
    %c0_1 = arith.constant 0 : index
    %c0_2 = arith.constant 0 : index
    %1 = vector.load %arg3[%c0_1, %c0_2] : memref<16x32xbf16, #tpu.memory_space<vmem>>, vector<16x32xbf16>
    %cst = arith.constant dense<0.000000e+00> : vector<8x16xf32>
    %2 = tpu.matmul %0, %1, %cst {dimension_numbers = #tpu.dot_dimension_numbers<[1], [1], [0], [0], [0, 0, 1, 0], [], []>} : vector<8x32xbf16>, vector<16x32xbf16>, vector<8x16xf32> -> vector<8x16xf32>
    %c0_3 = arith.constant 0 : index
    %c0_4 = arith.constant 0 : index
    %3 = vector.load %arg4[%c0_3, %c0_4] : memref<1x16xf32, #tpu.memory_space<vmem>>, vector<1x16xf32>
    %4 = vector.broadcast %3 : vector<1x16xf32> to vector<8x16xf32>
    %5 = arith.addf %2, %4 : vector<8x16xf32>
    %c0_5 = arith.constant 0 : index
    %c0_6 = arith.constant 0 : index
    %6 = vector.load %arg5[%c0_5, %c0_6] : memref<8x16xf32, #tpu.memory_space<vmem>>, vector<8x16xf32>
    tpu.vector_store %arg5[%c0_5, %c0_6], %5 {strides = array<i32>} : memref<8x16xf32, #tpu.memory_space<vmem>>, vector<8x16xf32>,
    return
  }
  func.func @transform_0(%arg0: i32, %arg1: i32) -> (i32, i32) {
    %c0_i32 = arith.constant 0 : i32
    %c0_i32_0 = arith.constant 0 : i32
    return %arg0, %c0_i32 : i32, i32
  }
  func.func @transform_1(%arg0: i32, %arg1: i32) -> (i32, i32) {
    %c0_i32 = arith.constant 0 : i32
    %c0_i32_0 = arith.constant 0 : i32
    return %arg1, %c0_i32 : i32, i32
  }
  func.func @transform_2(%arg0: i32, %arg1: i32) -> (i32, i32) {
    %c0_i32 = arith.constant 0 : i32
    %c0_i32_0 = arith.constant 0 : i32
    return %c0_i32, %arg1 : i32, i32
  }
  func.func @transform_3(%arg0: i32, %arg1: i32) -> (i32, i32) {
    %c0_i32 = arith.constant 0 : i32
    return %arg0, %arg1 : i32, i32
  }
}

</mosaic_0001>

<bundles_post_ra>
// kernel: tpu_custom_call.1
= control target key start
LH: loop header
LB: loop body
LE: loop exit
PB: predicated region body
PF: predicated region fallthrough
CT: control target
= control target key end

     0   :  { %8 = vsyncpa [#allocation3], 0  ;;  %s286_s0 = inlined_call_operand.hbm [shape: bf16[8,32], index: 0, kind: input, shape index: {}]   ;;  %s287_s1 = inlined_call_operand.hbm [shape: bf16[16,32], index: 1, kind: input, shape index: {}]   ;;  %s288_s2 = inlined_call_operand.vmem [shape: f32[1,16], index: 2, kind: input, shape index: {}]   ;;  %s289_s3 = inlined_call_operand.hbm [shape: f32[8,16], index: 3, kind: output, shape index: {}]  }
   0x1   :  { %9 = vsyncpa [#allocation6], 0 }
   0x2   :  { %10 = vsyncpa [#allocation4], 0  ;;  %s213_s12 = smov [#allocation2]   ;;  %s214_s14 = smov [#allocation5]  }
   0x3   :  { %s17_s13 = sshll.u32 %s213_s12, 4  ;;  %s26_s15 = sshll.u32 %s214_s14, 4  ;;  %s18_s13 = int_to_ptr.vmem [resolvable:$true] %s17_s13  ;;  %s240_s15 = int_to_ptr.vmem [resolvable:$true] %s26_s15 }
   0x4   :  { %s141_s18 = scalar_lea.hbm %s286_s0, 64 }
   0x5   :  { %p142_p0 = scmp.ne.s32.totalorder %s286_s0, %s141_s18  ;;  %p145_p1 = scmp.lt.u32.totalorder %s141_s18, %s286_s0 }
   0x7   :  { %p147_p2 = pnand %p145_p1, %p142_p0 }
   0x9   :  { %150 = shalt.err (!%p147_p2)
}
   0xa   :  { %s151_s23 = scalar_lea.vmem %s18_s13, 64  ;;  %p156_p4 = scmp.lt.s32.totalorder %s18_s13, %s18_s13 }
   0xb   :  { %p152_p3 = scmp.ne.s32.totalorder %s18_s13, %s151_s23  ;;  %p157_p5 = scmp.lt.s32.totalorder %s151_s23, %s151_s23 }
   0xd   :  { %p158_p6 = por %p157_p5, %p156_p4 }
   0xf   :  { %p159_p7 = pnand %p158_p6, %p152_p3 }
  0x11   :  { %162 = shalt.err (!%p159_p7)
}
  0x12   :  { %20 = dma.hbm_to_vmem [thread:$0]  %s286_s0, 64, %s18_s13, [#allocation3]  }
  0x13   :  { %s163_s28 = scalar_lea.hbm %s287_s1, 128 }
  0x14   :  { %p164_p8 = scmp.ne.s32.totalorder %s287_s1, %s163_s28  ;;  %p167_p9 = scmp.lt.u32.totalorder %s163_s28, %s287_s1 }
  0x16   :  { %p169_p10 = pnand %p167_p9, %p164_p8 }
  0x18   :  { %172 = shalt.err (!%p169_p10)
}
  0x19   :  { %s173_s6 = scalar_lea.vmem %s240_s15, 128  ;;  %p178_p12 = scmp.lt.s32.totalorder %s240_s15, %s240_s15 }
  0x1a   :  { %p174_p11 = scmp.ne.s32.totalorder %s240_s15, %s173_s6  ;;  %p179_p13 = scmp.lt.s32.totalorder %s173_s6, %s173_s6 }
  0x1c   :  { %p180_p0 = por %p179_p13, %p178_p12 }
  0x1e   :  { %p181_p1 = pnand %p180_p0, %p174_p11 }
  0x20   :  { %184 = shalt.err (!%p181_p1)
}
  0x21   :  { %s215_s0 = smov 64   ;;  %s216_s7 = smov 4  }
  0x22   :  { %32 = dma.hbm_to_vmem [thread:$0]  %s287_s1, 128, %s240_s15, [#allocation6], %s215_s0, %s215_s0, %s216_s7  }
  0x23   :  { %207 = dma.done.wait [#allocation3], 64  }
  0x24   :  { %208 = vsyncadd [#allocation3], 4294967232 }
  0x25   :  { %209 = dma.done.wait [#allocation6], 128  }
  0x26   :  { %210 = vsyncadd [#allocation6], 4294967168  ;;  %v217_v0 = vmov 0.0   ;;  %vm218_vm0 = vmmov 0   ;;  %vm57_vm1 = vcmask 261120   ;;  %v140_v1 = vld [vmem:[#allocation5] sm:$0xff]  }
  0x27   :  { %127 = vmatprep.subr.bf16.mxu0 %v217_v0  ;;  %129 = vmatprep.mubr.msk.bf16.mxu0 %vm218_vm0, %v217_v0  ;;  %v62_v2 = vsel %vm57_vm1, %v140_v1, 0  ;;  %v42_v3 = vld [vmem:[#allocation2] sm:$0xf]  ;;  %s219_s12 = smov [#allocation7]   ;;  %vm104_vm2 = vcmask 130048  }
  0x28   :  { %128 = vmatpush3.bf16.xpose.msra.mxu0 %v62_v2  ;;  %v122_v4 = vld [vmem:[%s288_s2] ss:$0 sm:$0xff]  ;;  %s112_s1 = sshll.u32 %s219_s12, 4  ;;  %s113_s1 = int_to_ptr.vmem [resolvable:$true] %s112_s1 }
  0x29   :  { %s185_s13 = scalar_lea.vmem %s113_s1, 128  ;;  %p190_p3 = scmp.lt.s32.totalorder %s113_s1, %s113_s1 }
  0x2a   :  { %p186_p2 = scmp.ne.s32.totalorder %s113_s1, %s185_s13  ;;  %p191_p4 = scmp.lt.s32.totalorder %s185_s13, %s185_s13 }
  0x2c   :  { %p192_p5 = por %p191_p4, %p190_p3 }
  0x2e   :  { %p193_p6 = pnand %p192_p5, %p186_p2 }
  0x2f   :  { %130 = vmatmul.mubr.msk.bf16.vlgmr.msra.gmra.mrb[0].mxu0 %vm57_vm1, %v42_v3 }
 0x102   :  { %v98_v5 = vpop.f32.mrb[0].mxu0 }
 0x103   :  { %v99_v6 = vadd.f32 %v122_v4, %v98_v5  ;;  %v131_v7 = vpop.f32.mrb[1].mxu0 }
 0x104   :  { %v101_v8 = vpop.f32.mrb[2].mxu0 }
 0x105   :  { %v132_v9 = vpop.f32.mrb[3].mxu0  ;;  %105 = vst.msk [vmem:[#allocation7] sm:$0xff] %vm104_vm2, %v99_v6 }
 0x106   :  { %196 = shalt.err (!%p193_p6)
}
 0x107   :  { %s197_s2 = scalar_lea.hbm %s289_s3, 128 }
 0x108   :  { %p198_p7 = scmp.ne.s32.totalorder %s289_s3, %s197_s2  ;;  %p201_p8 = scmp.lt.u32.totalorder %s197_s2, %s289_s3 }
 0x10a   :  { %p203_p9 = pnand %p201_p8, %p198_p7 }
 0x10c   :  { %206 = shalt.err (!%p203_p9)
}
 0x10d   :  { %115 = dma.vmem_to_hbm [thread:$0]  %s113_s1, 128, %s289_s3, [#allocation4]  }
 0x10e   :  { %211 = dma.done.wait [#allocation4], 128  }
 0x10f   :  { %212 = vsyncadd [#allocation4], 4294967168 }
 0x110   :  { %119 = vsyncpa [#allocation3], 1 }
 0x111   :  { %120 = vsyncpa [#allocation6], 1 }
 0x112   :  { %121 = vsyncpa [#allocation4], 1 }

</bundles_post_ra>
